<compile_context>
chip_gen: v7x
topology: tpu7x:2x2x1
jax: 0.10.0
libtpu: 0.0.40
codegen_flags: <defaults>
</compile_context>

<pallas_src>
import math
from functools import partial

import jax
import jax.numpy as jnp
from jax import lax
from jax.experimental import pallas as pl
from jax.experimental.pallas import tpu as pltpu

_EPS = 1e-12  # F.normalize default eps
_EPS2 = _EPS * _EPS


# ----------------------------------------------------------------------------
# Helpers
# ----------------------------------------------------------------------------
def _round_up(v, m):
    return -(-v // m) * m


def _pad2(a, rows, cols):
    r, c = a.shape
    if (r, c) == (rows, cols):
        return a
    return jnp.pad(a, ((0, rows - r), (0, cols - c)))


def _pick_tile(dim, align, max_tile=256, max_waste=0.125):
    """Largest tile (<= max_tile, multiple of `align`) keeping padding waste low."""
    dim_aligned = _round_up(dim, align)
    if dim_aligned <= max_tile:
        return dim_aligned
    candidates = []
    t = max_tile
    while t >= align:
        candidates.append(t)
        t //= 2
    for c in candidates:  # largest first
        if (_round_up(dim, c) - dim) / dim <= max_waste:
            return c
    # No low-waste candidate: minimize padded size, prefer larger tile on ties.
    return min(candidates, key=lambda c: (_round_up(dim, c), -c))


def _pick_k_tile(k_aligned, tm, tn, in_bytes, budget=20 * 2**20):
    """Full-K block if it fits the VMEM budget, else a 128-multiple K block."""
    out_bytes = 2 * tm * tn * 4  # double-buffered f32 output tile

    def est(tk):
        return 2 * (tm + tn) * tk * in_bytes + out_bytes

    if est(k_aligned) <= budget:
        return k_aligned
    tk = (budget - out_bytes) // (2 * (tm + tn) * in_bytes)
    tk = max(512, (tk // 128) * 128)
    return min(tk, k_aligned)


# ----------------------------------------------------------------------------
# Kernels
# ----------------------------------------------------------------------------
def _normalize_rows_kernel(a_ref, o_ref):
    """Row-wise L2 normalize: o = a / max(||a||_2, eps), cast to o dtype."""
    a = a_ref[...].astype(jnp.float32)
    ss = jnp.sum(a * a, axis=-1, keepdims=True)
    inv = lax.rsqrt(jnp.maximum(ss, jnp.float32(_EPS2)))  # EUP rsqrt
    o_ref[...] = (a * inv).astype(o_ref.dtype)


def _cosine_matmul_kernel(xn_ref, wn_ref, o_ref):
    """Pure matmul of pre-normalized operands; accumulates over the k axis."""
    @pl.when(pl.program_id(2) == 0)
    def _():
        o_ref[...] = jnp.zeros_like(o_ref)

    # Contract the feature axis of both operands directly (no transpose).
    o_ref[...] += lax.dot_general(
        xn_ref[...], wn_ref[...],
        dimension_numbers=(((1,), (1,)), ((), ())),
        preferred_element_type=jnp.float32,
    )


def _fused_small_kernel(x_ref, w_ref, o_ref, *, mm_dtype):
    """Single-block path for tiny heads: normalize both operands + matmul."""
    eps2 = jnp.float32(_EPS2)
    x = x_ref[...].astype(jnp.float32)
    xn = x * lax.rsqrt(jnp.maximum(jnp.sum(x * x, axis=-1, keepdims=True), eps2))
    w = w_ref[...].astype(jnp.float32)
    wn = w * lax.rsqrt(jnp.maximum(jnp.sum(w * w, axis=-1, keepdims=True), eps2))
    o_ref[...] = lax.dot_general(
        xn.astype(mm_dtype), wn.astype(mm_dtype),
        dimension_numbers=(((1,), (1,)), ((), ())),
        preferred_element_type=jnp.float32,
    )


# ----------------------------------------------------------------------------
# Pre-pass: one-shot row normalization (weight or activations)
# ----------------------------------------------------------------------------
def _normalize_rows(a_p, out_dtype):
    rows, k_p = a_p.shape
    in_b = jnp.dtype(a_p.dtype).itemsize
    out_b = jnp.dtype(out_dtype).itemsize
    budget = 12 * 2**20

    def fits(r):
        return 2 * r * k_p * (in_b + out_b) <= budget

    rt = (min(rows, 512) // 8) * 8
    while rt > 8 and not (rows % rt == 0 and fits(rt)):
        rt -= 8
    rt = max(rt, 8)  # rows is always a multiple of 8

    return pl.pallas_call(
        _normalize_rows_kernel,
        out_shape=jax.ShapeDtypeStruct((rows, k_p), out_dtype),
        grid=(rows // rt,),
        in_specs=[pl.BlockSpec((rt, k_p), lambda r: (r, 0))],
        out_specs=pl.BlockSpec((rt, k_p), lambda r: (r, 0)),
        compiler_params=pltpu.CompilerParams(
            dimension_semantics=("parallel",),
            vmem_limit_bytes=32 * 2**20),
    )(a_p)


# ----------------------------------------------------------------------------
# Public entry point
# ----------------------------------------------------------------------------
def metric_layer(x, weight, *, precision="bf16"):
    """Pallas implementation of MetricLayer.forward (cosine metric).

    x: [B, n_in], weight: [n_out, n_in] -> [B, n_out] float32.
    precision: "bf16" (default, MXU-native operands, f32 accumulation) or "fp32".
    """
    assert precision in ("bf16", "fp32")
    B, K = x.shape
    N, K2 = weight.shape
    assert K == K2, "feature dims of x and weight must match"

    mm_dtype = jnp.bfloat16 if precision == "bf16" else jnp.float32
    in_bytes = jnp.dtype(mm_dtype).itemsize

    b_a = _round_up(B, 8)
    n_a = _round_up(N, 128)
    k_a = _round_up(K, 128)

    # ---- Tiny-head fast path: single fused kernel, no pre-pass round trips.
    if (b_a <= 256 and n_a <= 256
            and (b_a + n_a) * k_a * 4 + b_a * n_a * 4 <= 4 * 2**20):
        x_p = _pad2(x, b_a, k_a)
        w_p = _pad2(weight, n_a, k_a)
        out = pl.pallas_call(
            partial(_fused_small_kernel, mm_dtype=mm_dtype),
            out_shape=jax.ShapeDtypeStruct((b_a, n_a), jnp.float32),
            compiler_params=pltpu.CompilerParams(vmem_limit_bytes=48 * 2**20),
        )(x_p, w_p)
        return out[:B, :N]

    # ---- General tiled path.
    tm = _pick_tile(B, 8, 256)      # sublane-aligned batch tile, padding-aware
    tn = _pick_tile(N, 128, 256)    # lane-dense output tile
    tk = _pick_k_tile(k_a, tm, tn, in_bytes)

    b_p = _round_up(B, tm)
    n_p = _round_up(N, tn)
    k_p = _round_up(K, tk)

    x_p = _pad2(x, b_p, k_p)
    w_p = _pad2(weight, n_p, k_p)

    # One-shot normalization pre-passes (amortized; also cast to matmul dtype).
    xn = _normalize_rows(x_p, mm_dtype)
    wn = _normalize_rows(w_p, mm_dtype)

    # Grid order: hold the larger operand on the outer axis (fetched once from
    # HBM, Pallas skips re-DMA when its block index doesn't change); stream the
    # smaller operand on the inner axis.  Outer axis is also the megacore axis.
    n_major = n_p >= b_p
    if n_major:
        grid = (n_p // tn, b_p // tm, k_p // tk)
        x_map = lambda j, i, k: (i, k)
        w_map = lambda j, i, k: (j, k)
        o_map = lambda j, i, k: (i, j)
    else:
        grid = (b_p // tm, n_p // tn, k_p // tk)
        x_map = lambda i, j, k: (i, k)
        w_map = lambda i, j, k: (j, k)
        o_map = lambda i, j, k: (i, j)

    # Per-step VMEM estimate (double-buffered inputs + output) -> explicit limit.
    vmem_est = 2 * (tm + tn) * tk * in_bytes + 2 * tm * tn * 4
    vmem_limit = int(min(56 * 2**20, max(32 * 2**20, 2 * vmem_est + 2 * 2**20)))

    outer_extent, inner_extent, kt = grid
    held_elems = (n_p if n_major else b_p) * k_p
    streamed_elems = (b_p if n_major else n_p) * k_p
    held_fetches = 1 if kt == 1 else inner_extent
    streamed_fetches = 1 if inner_extent == 1 else outer_extent
    cost = pl.CostEstimate(
        flops=int(2 * b_p * n_p * k_p),
        transcendentals=0,
        bytes_accessed=int(in_bytes * (held_fetches * held_elems
                                       + streamed_fetches * streamed_elems)
                           + 4 * b_p * n_p),
    )

    out = pl.pallas_call(
        _cosine_matmul_kernel,
        out_shape=jax.ShapeDtypeStruct((b_p, n_p), jnp.float32),
        grid=grid,
        in_specs=[
            pl.BlockSpec((tm, tk), x_map),
            pl.BlockSpec((tn, tk), w_map),
        ],
        out_specs=pl.BlockSpec((tm, tn), o_map),
        compiler_params=pltpu.CompilerParams(
            dimension_semantics=("parallel", "parallel", "arbitrary"),
            vmem_limit_bytes=vmem_limit),
        cost_estimate=cost,
    )(xn, wn)

    return out[:B, :N]


# ----------------------------------------------------------------------------
# Init / reference / self-test
# ----------------------------------------------------------------------------
def xavier_uniform(key, n_out, n_in, gain=1.0, dtype=jnp.float32):
    # Matches nn.init.xavier_uniform_ for a [n_out, n_in] parameter.
    bound = gain * math.sqrt(6.0 / (n_in + n_out))
    return jax.random.uniform(key, (n_out, n_in), dtype=dtype,
                              minval=-bound, maxval=bound)


def reference(x, weight):
    xn = x / jnp.maximum(jnp.linalg.norm(x, axis=-1, keepdims=True), 1e-12)
    wn = weight / jnp.maximum(jnp.linalg.norm(weight, axis=-1, keepdims=True), 1e-12)
    return xn @ wn.T


if __name__ == "__main__":
    key = jax.random.PRNGKey(0)
    k1, k2, k3, k4, k5, k6 = jax.random.split(key, 6)

    # 1) Module-default small head (fused single-block path): B=8, n_in=32, n_out=10.
    B, K, N = 8, 32, 10
    x = jax.random.normal(k1, (B, K), dtype=jnp.float32)
    w = xavier_uniform(k2, N, K)
    out = jax.block_until_ready(metric_layer(x, w))                 # bf16 default
    ref = reference(x, w)
    assert out.shape == (B, N)
    assert jnp.allclose(out, ref, atol=2e-2), "fused bf16 mismatch"
    out32 = jax.block_until_ready(metric_layer(x, w, precision="fp32"))
    assert jnp.allclose(out32, ref, atol=2e-5), "fused fp32 mismatch"

    # 2) Tiled n-major path (weight held on outer axis, x streamed), bf16 MXU.
    B, K, N = 300, 256, 600
    x = jax.random.normal(k3, (B, K), dtype=jnp.float32)
    w = xavier_uniform(k4, N, K)
    out = jax.block_until_ready(metric_layer(x, w))
    ref = reference(x, w)
    assert out.shape == (B, N)
    assert jnp.allclose(out, ref, atol=1e-2), "tiled bf16 mismatch"

    # 3) Tiled batch-major path, strict fp32.
    B, K, N = 300, 384, 200
    x = jax.random.normal(k5, (B, K), dtype=jnp.float32)
    w = xavier_uniform(k6, N, K)
    out = jax.block_until_ready(metric_layer(x, w, precision="fp32"))
    ref = reference(x, w)
    assert out.shape == (B, N)
    assert jnp.allclose(out, ref, atol=2e-4, rtol=2e-4), "tiled fp32 mismatch"

    print("KERNEL_OK")
</pallas_src>

<mosaic_0001>
module attributes {stable_mosaic.version = 11 : i64} {
  func.func @_fused_small_kernel(%arg0: memref<8x128xf32, #tpu.memory_space<vmem>>, %arg1: memref<128x128xf32, #tpu.memory_space<vmem>>, %arg2: memref<8x128xf32, #tpu.memory_space<vmem>>) attributes {dimension_semantics = [], scalar_prefetch = 0 : i64, scratch_operands = 0 : i64, tpu.core_type = #tpu.core_type<tc>} {
    %c0 = arith.constant 0 : index
    %c0_0 = arith.constant 0 : index
    %0 = vector.load %arg0[%c0, %c0_0] : memref<8x128xf32, #tpu.memory_space<vmem>>, vector<8x128xf32>
    %1 = arith.mulf %0, %0 : vector<8x128xf32>
    %cst = arith.constant dense<0.000000e+00> : vector<8xf32>
    %2 = vector.multi_reduction <add>, %1, %cst [1] : vector<8x128xf32> to vector<8xf32>
    %3 = vector.shape_cast %2 : vector<8xf32> to vector<8x1xf32>
    %cst_1 = arith.constant 1.000000e-24 : f32
    %4 = vector.broadcast %cst_1 : f32 to vector<8x1xf32>
    %5 = arith.maximumf %3, %4 : vector<8x1xf32>
    %6 = math.rsqrt %5 : vector<8x1xf32>
    %7 = vector.broadcast %6 : vector<8x1xf32> to vector<8x128xf32>
    %8 = arith.mulf %0, %7 : vector<8x128xf32>
    %c0_2 = arith.constant 0 : index
    %c0_3 = arith.constant 0 : index
    %9 = vector.load %arg1[%c0_2, %c0_3] : memref<128x128xf32, #tpu.memory_space<vmem>>, vector<128x128xf32>
    %10 = arith.mulf %9, %9 : vector<128x128xf32>
    %cst_4 = arith.constant dense<0.000000e+00> : vector<128xf32>
    %11 = vector.multi_reduction <add>, %10, %cst_4 [1] : vector<128x128xf32> to vector<128xf32>
    %12 = vector.shape_cast %11 : vector<128xf32> to vector<128x1xf32>
    %cst_5 = arith.constant 1.000000e-24 : f32
    %13 = vector.broadcast %cst_5 : f32 to vector<128x1xf32>
    %14 = arith.maximumf %12, %13 : vector<128x1xf32>
    %15 = math.rsqrt %14 : vector<128x1xf32>
    %16 = vector.broadcast %15 : vector<128x1xf32> to vector<128x128xf32>
    %17 = arith.mulf %9, %16 : vector<128x128xf32>
    %18 = arith.truncf %8 : vector<8x128xf32> to vector<8x128xbf16>
    %19 = arith.truncf %17 : vector<128x128xf32> to vector<128x128xbf16>
    %cst_6 = arith.constant dense<0.000000e+00> : vector<8x128xf32>
    %20 = tpu.matmul %18, %19, %cst_6 {dimension_numbers = #tpu.dot_dimension_numbers<[1], [1], [0], [0], [0, 0, 1, 0], [], []>} : vector<8x128xbf16>, vector<128x128xbf16>, vector<8x128xf32> -> vector<8x128xf32>
    %c0_7 = arith.constant 0 : index
    %c0_8 = arith.constant 0 : index
    %21 = vector.load %arg2[%c0_7, %c0_8] : memref<8x128xf32, #tpu.memory_space<vmem>>, vector<8x128xf32>
    tpu.vector_store %arg2[%c0_7, %c0_8], %20 {strides = array<i32>} : memref<8x128xf32, #tpu.memory_space<vmem>>, vector<8x128xf32>,
    return
  }
}

</mosaic_0001>

<bundles_post_ra>
// kernel: tpu_custom_call.1
= control target key start
LH: loop header
LB: loop body
LE: loop exit
PB: predicated region body
PF: predicated region fallthrough
CT: control target
= control target key end

     0   :  { %7 = vsyncpa [#allocation3], 0  ;;  %s525_s0 = inlined_call_operand.hbm [shape: f32[8,128], index: 0, kind: input, shape index: {}]   ;;  %s526_s1 = inlined_call_operand.hbm [shape: f32[128,128], index: 1, kind: input, shape index: {}]   ;;  %s527_s2 = inlined_call_operand.hbm [shape: f32[8,128], index: 2, kind: output, shape index: {}]  }
   0x1   :  { %8 = vsyncpa [#allocation6], 0 }
   0x2   :  { %9 = vsyncpa [#allocation4], 0  ;;  %s366_s9 = smov [#allocation2]   ;;  %s367_s11 = smov [#allocation5]  }
   0x3   :  { %s16_s10 = sshll.u32 %s366_s9, 4  ;;  %s25_s12 = sshll.u32 %s367_s11, 4  ;;  %s17_s10 = int_to_ptr.vmem [resolvable:$true] %s16_s10  ;;  %s388_s12 = int_to_ptr.vmem [resolvable:$true] %s25_s12 }
   0x4   :  { %s294_s15 = scalar_lea.hbm %s525_s0, 128 }
   0x5   :  { %p295_p0 = scmp.ne.s32.totalorder %s525_s0, %s294_s15  ;;  %p298_p1 = scmp.lt.u32.totalorder %s294_s15, %s525_s0 }
   0x7   :  { %p300_p2 = pnand %p298_p1, %p295_p0 }
   0x9   :  { %303 = shalt.err (!%p300_p2)
}
   0xa   :  { %s304_s20 = scalar_lea.vmem %s17_s10, 128  ;;  %p309_p4 = scmp.lt.s32.totalorder %s17_s10, %s17_s10 }
   0xb   :  { %p305_p3 = scmp.ne.s32.totalorder %s17_s10, %s304_s20  ;;  %p310_p5 = scmp.lt.s32.totalorder %s304_s20, %s304_s20 }
   0xd   :  { %p311_p6 = por %p310_p5, %p309_p4 }
   0xf   :  { %p312_p7 = pnand %p311_p6, %p305_p3 }
  0x11   :  { %315 = shalt.err (!%p312_p7)
}
  0x12   :  { %19 = dma.hbm_to_vmem [thread:$0]  %s525_s0, 128, %s17_s10, [#allocation3]  }
  0x13   :  { %s316_s25 = scalar_lea.hbm %s526_s1, 2048 }
  0x14   :  { %p317_p8 = scmp.ne.s32.totalorder %s526_s1, %s316_s25  ;;  %p320_p9 = scmp.lt.u32.totalorder %s316_s25, %s526_s1 }
  0x16   :  { %p322_p10 = pnand %p320_p9, %p317_p8 }
  0x18   :  { %325 = shalt.err (!%p322_p10)
}
  0x19   :  { %s326_s30 = scalar_lea.vmem %s388_s12, 2048  ;;  %p331_p12 = scmp.lt.s32.totalorder %s388_s12, %s388_s12 }
  0x1a   :  { %p327_p11 = scmp.ne.s32.totalorder %s388_s12, %s326_s30  ;;  %p332_p13 = scmp.lt.s32.totalorder %s326_s30, %s326_s30 }
  0x1c   :  { %p333_p0 = por %p332_p13, %p331_p12 }
  0x1e   :  { %p334_p1 = pnand %p333_p0, %p327_p11 }
  0x20   :  { %337 = shalt.err (!%p334_p1)
}
  0x21   :  { %s368_s0 = smov 128   ;;  %s369_s3 = smov 8  }
  0x22   :  { %31 = dma.hbm_to_vmem [thread:$0]  %s526_s1, 2048, %s388_s12, [#allocation6], %s368_s0, %s368_s0, %s369_s3  }
  0x23   :  { %360 = dma.done.wait [#allocation3], 128  }
  0x24   :  { %361 = vsyncadd [#allocation3], 4294967168 }
  0x25   :  { %362 = dma.done.wait [#allocation6], 2048  }
  0x26   :  { %363 = vsyncadd [#allocation6], 4294965248  ;;  %v419_v0 = vld [vmem:[#allocation5] sm:$0xff]  ;;  %v421_v1 = vld [vmem:[#allocation5 + $0x10] sm:$0xff]  ;;  %v370_v33 = vmov 0.0   ;;  %vm371_vm0 = vmmov 0  }
  0x27   :  { %v423_v2 = vld [vmem:[#allocation5 + $0x8] sm:$0xff]  ;;  %v62_v3 = vmul.f32 %v419_v0, %v419_v0  ;;  %v64_v4 = vmul.f32 %v421_v1, %v421_v1  ;;  %v429_v5 = vld [vmem:[#allocation5 + $0x18] sm:$0xff]  ;;  %v437_v9 = vld [vmem:[#allocation5 + $0x20] sm:$0xff]  ;;  %233 = vmatprep.subr.bf16.mxu0 %v370_v33  ;;  %249 = vmatprep.mubr.msk.bf16.mxu0 %vm371_vm0, %v370_v33  ;;  %s372_s1 = smov [#allocation7]  }
  0x28   :  { %v63_v6 = vmul.f32 %v423_v2, %v423_v2  ;;  %v65_v7 = vmul.f32 %v429_v5, %v429_v5  ;;  %v435_v8 = vld [vmem:[#allocation5 + $0x28] sm:$0xff]  ;;  %v66_v11 = vmul.f32 %v437_v9, %v437_v9  ;;  %v443_v12 = vld [vmem:[#allocation5 + $0x38] sm:$0xff]  ;;  %v445_v13 = vld [vmem:[#allocation5 + $0x30] sm:$0xff]  ;;  %s214_s6 = sshll.u32 %s372_s1, 4  ;;  %s215_s6 = int_to_ptr.vmem [resolvable:$true] %s214_s6 }
  0x29   :  { %78 = vadd.xlane.f32.xlu0 %v62_v3  ;;  %82 = vadd.xlane.f32.xlu1 %v64_v4  ;;  %v67_v10 = vmul.f32 %v435_v8, %v435_v8  ;;  %v69_v14 = vmul.f32 %v443_v12, %v443_v12  ;;  %v68_v15 = vmul.f32 %v445_v13, %v445_v13  ;;  %v451_v16 = vld [vmem:[#allocation5 + $0x48] sm:$0xff]  ;;  %v453_v17 = vld [vmem:[#allocation5 + $0x40] sm:$0xff]  ;;  %v459_v20 = vld [vmem:[#allocation5 + $0x58] sm:$0xff]  ;;  %s338_s7 = scalar_lea.vmem %s215_s6, 128  ;;  %p343_p3 = scmp.lt.s32.totalorder %s215_s6, %s215_s6 }
  0x2a   :  { %v71_v18 = vmul.f32 %v451_v16, %v451_v16  ;;  %v70_v19 = vmul.f32 %v453_v17, %v453_v17  ;;  %v461_v21 = vld [vmem:[#allocation5 + $0x50] sm:$0xff]  ;;  %v73_v22 = vmul.f32 %v459_v20, %v459_v20  ;;  %v467_v24 = vld [vmem:[#allocation5 + $0x68] sm:$0xff]  ;;  %v469_v25 = vld [vmem:[#allocation5 + $0x60] sm:$0xff]  ;;  %p339_p2 = scmp.ne.s32.totalorder %s215_s6, %s338_s7  ;;  %p344_p4 = scmp.lt.s32.totalorder %s338_s7, %s338_s7 }
  0x2b   :  { %v72_v23 = vmul.f32 %v461_v21, %v461_v21  ;;  %v75_v26 = vmul.f32 %v467_v24, %v467_v24  ;;  %v74_v27 = vmul.f32 %v469_v25, %v469_v25  ;;  %v475_v28 = vld [vmem:[#allocation5 + $0x78] sm:$0xff]  ;;  %v477_v29 = vld [vmem:[#allocation5 + $0x70] sm:$0xff] }
  0x2c   :  { %v77_v30 = vmul.f32 %v475_v28, %v475_v28  ;;  %v76_v31 = vmul.f32 %v477_v29, %v477_v29  ;;  %v483_v32 = vld [vmem:[#allocation2] sm:$0xff]  ;;  %p345_p5 = por %p344_p4, %p343_p3 }
  0x2d   :  { %80 = vadd.xlane.f32.xlu0 %v63_v6  ;;  %84 = vadd.xlane.f32.xlu1 %v65_v7  ;;  %v40_v34 = vmul.f32 %v483_v32, %v483_v32 }
  0x2e   :  { %p346_p6 = pnand %p345_p5, %p339_p2 }
  0x31   :  { %88 = vadd.xlane.f32.xlu1 %v67_v10  ;;  %86 = vadd.xlane.f32.xlu0 %v66_v11 }
  0x35   :  { %92 = vadd.xlane.f32.xlu1 %v69_v14  ;;  %90 = vadd.xlane.f32.xlu0 %v68_v15 }
  0x39   :  { %96 = vadd.xlane.f32.xlu1 %v71_v18  ;;  %94 = vadd.xlane.f32.xlu0 %v70_v19 }
  0x3d   :  { %100 = vadd.xlane.f32.xlu1 %v73_v22  ;;  %98 = vadd.xlane.f32.xlu0 %v72_v23 }
  0x41   :  { %104 = vadd.xlane.f32.xlu1 %v75_v26  ;;  %102 = vadd.xlane.f32.xlu0 %v74_v27 }
  0x45   :  { %108 = vadd.xlane.f32.xlu1 %v77_v30  ;;  %106 = vadd.xlane.f32.xlu0 %v76_v31 }
  0x49   :  { %41 = vadd.xlane.f32.xlu0 %v40_v34 }
  0xb6   :  { %v79_v35 = vpop.xlane.xlu0 %78  ;;  %v83_v36 = vpop.xlane.xlu1 %82 }
  0xb7   :  { %v110_v37 = vmax.f32 %v79_v35, 1e-24  ;;  %v112_v41 = vmax.f32 %v83_v36, 1e-24 }
  0xb9   :  { %260 = vrsqrt.f32 %v110_v37 }
  0xba   :  { %v81_v38 = vpop.xlane.xlu0 %80  ;;  %v85_v39 = vpop.xlane.xlu1 %84 }
  0xbb   :  { %v111_v40 = vmax.f32 %v81_v38, 1e-24  ;;  %v113_v42 = vmax.f32 %v85_v39, 1e-24 }
  0xbd   :  { %262 = vrsqrt.f32 %v111_v40 }
  0xbe   :  { %v89_v43 = vpop.xlane.xlu1 %88  ;;  %264 = vrsqrt.f32 %v112_v41  ;;  %v87_v44 = vpop.xlane.xlu0 %86 }
  0xbf   :  { %266 = vrsqrt.f32 %v113_v42  ;;  %v115_v45 = vmax.f32 %v89_v43, 1e-24  ;;  %v114_v46 = vmax.f32 %v87_v44, 1e-24 }
  0xc1   :  { %268 = vrsqrt.f32 %v115_v45 }
  0xc2   :  { %270 = vrsqrt.f32 %v114_v46  ;;  %v93_v49 = vpop.xlane.xlu1 %92  ;;  %v91_v52 = vpop.xlane.xlu0 %90 }
  0xc3   :  { %v261_v47 = vpop.eup %260  ;;  %v117_v55 = vmax.f32 %v93_v49, 1e-24  ;;  %v116_v57 = vmax.f32 %v91_v52, 1e-24 }
  0xc4   :  { %v142_v50 = vmul.f32 %v261_v47, %v419_v0 }
  0xc5   :  { %272 = vrsqrt.f32 %v117_v55 }
  0xc6   :  { %274 = vrsqrt.f32 %v116_v57  ;;  %v97_v60 = vpop.xlane.xlu1 %96  ;;  %v95_v62 = vpop.xlane.xlu0 %94 }
  0xc7   :  { %v263_v48 = vpop.eup %262  ;;  %v118_v3 = vmax.f32 %v95_v62, 1e-24 }
  0xc8   :  { %v143_v51 = vmul.f32 %v263_v48, %v423_v2  ;;  %v265_v53 = vpop.eup %264  ;;  %v119_v2 = vmax.f32 %v97_v60, 1e-24 }
  0xc9   :  { %v267_v56 = vpop.eup %266  ;;  %v144_v58 = vmul.f32 %v265_v53, %v421_v1 }
  0xca   :  { %v159_v54 = vpack.c.bf16 %v143_v51, %v142_v50  ;;  %v145_v59 = vmul.f32 %v267_v56, %v429_v5  ;;  %276 = vrsqrt.f32 %v119_v2  ;;  %v101_v1 = vpop.xlane.xlu1 %100  ;;  %v99_v10 = vpop.xlane.xlu0 %98 }
  0xcb   :  { %v269_v61 = vpop.eup %268  ;;  %278 = vrsqrt.f32 %v118_v3  ;;  %v121_v14 = vmax.f32 %v101_v1, 1e-24  ;;  %v120_v15 = vmax.f32 %v99_v10, 1e-24 }
  0xcc   :  { %234 = vmatpush3.bf16.xpose.msra.mxu0 %v159_v54  ;;  %v271_v63 = vpop.eup %270  ;;  %v160_v0 = vpack.c.bf16 %v145_v59, %v144_v58  ;;  %v147_v6 = vmul.f32 %v269_v61, %v435_v8 }
  0xcd   :  { %235 = vmatprep.subr.bf16.mxu0 %v370_v33  ;;  %v146_v4 = vmul.f32 %v271_v63, %v437_v9  ;;  %280 = vrsqrt.f32 %v121_v14 }
  0xce   :  { %282 = vrsqrt.f32 %v120_v15  ;;  %v105_v8 = vpop.xlane.xlu1 %104  ;;  %v103_v23 = vpop.xlane.xlu0 %102 }
  0xcf   :  { %v273_v7 = vpop.eup %272  ;;  %v161_v5 = vpack.c.bf16 %v147_v6, %v146_v4  ;;  %v123_v27 = vmax.f32 %v105_v8, 1e-24  ;;  %v122_v30 = vmax.f32 %v103_v23, 1e-24 }
  0xd0   :  { %v275_v11 = vpop.eup %274  ;;  %v149_v19 = vmul.f32 %v273_v7, %v443_v12 }
  0xd1   :  { %v148_v18 = vmul.f32 %v275_v11, %v445_v13  ;;  %284 = vrsqrt.f32 %v123_v27 }
  0xd2   :  { %286 = vrsqrt.f32 %v122_v30  ;;  %v109_v12 = vpop.xlane.xlu1 %108  ;;  %v107_v36 = vpop.xlane.xlu0 %106 }
  0xd3   :  { %v162_v22 = vpack.c.bf16 %v149_v19, %v148_v18  ;;  %v125_v38 = vmax.f32 %v109_v12, 1e-24  ;;  %v124_v39 = vmax.f32 %v107_v36, 1e-24 }
  0xd4   :  { %236 = vmatpush3.bf16.xpose.msra.mxu0 %v160_v0  ;;  %v277_v9 = vpop.eup %276 }
  0xd5   :  { %237 = vmatprep.subr.bf16.mxu0 %v370_v33  ;;  %v279_v26 = vpop.eup %278  ;;  %v151_v34 = vmul.f32 %v277_v9, %v451_v16  ;;  %288 = vrsqrt.f32 %v125_v38 }
  0xd6   :  { %v150_v31 = vmul.f32 %v279_v26, %v453_v17  ;;  %290 = vrsqrt.f32 %v124_v39  ;;  %v42_v16 = vpop.xlane.xlu0 %41 }
  0xd7   :  { %v281_v13 = vpop.eup %280  ;;  %v43_v44 = vmax.f32 %v42_v16, 1e-24 }
  0xd8   :  { %v163_v35 = vpack.c.bf16 %v151_v34, %v150_v31  ;;  %v283_v37 = vpop.eup %282  ;;  %v153_v41 = vmul.f32 %v281_v13, %v459_v20 }
  0xd9   :  { %v152_v40 = vmul.f32 %v283_v37, %v461_v21  ;;  %292 = vrsqrt.f32 %v43_v44 }
  0xdb   :  { %v285_v17 = vpop.eup %284  ;;  %v164_v42 = vpack.c.bf16 %v153_v41, %v152_v40 }
  0xdc   :  { %238 = vmatpush3.bf16.xpose.msra.mxu0 %v161_v5  ;;  %v287_v43 = vpop.eup %286  ;;  %v155_v46 = vmul.f32 %v285_v17, %v467_v24 }
  0xdd   :  { %239 = vmatprep.subr.bf16.mxu0 %v370_v33  ;;  %v154_v45 = vmul.f32 %v287_v43, %v469_v25 }
  0xdf   :  { %v289_v21 = vpop.eup %288  ;;  %v165_v47 = vpack.c.bf16 %v155_v46, %v154_v45 }
  0xe0   :  { %v291_v20 = vpop.eup %290  ;;  %v157_v49 = vmul.f32 %v289_v21, %v475_v28 }
  0xe1   :  { %v156_v48 = vmul.f32 %v291_v20, %v477_v29 }
  0xe3   :  { %v293_v50 = vpop.eup %292  ;;  %v166_v51 = vpack.c.bf16 %v157_v49, %v156_v48 }
  0xe4   :  { %240 = vmatpush3.bf16.xpose.msra.mxu0 %v162_v22  ;;  %v45_v52 = vmul.f32 %v293_v50, %v483_v32 }
  0xe5   :  { %241 = vmatprep.subr.bf16.mxu0 %v370_v33 }
  0xe6   :  { %v158_v25 = vpack.c.bf16 %v45_v52, %v45_v52 }
  0xec   :  { %242 = vmatpush3.bf16.xpose.msra.mxu0 %v163_v35 }
  0xed   :  { %243 = vmatprep.subr.bf16.mxu0 %v370_v33 }
  0xf4   :  { %244 = vmatpush3.bf16.xpose.msra.mxu0 %v164_v42 }
  0xf5   :  { %245 = vmatprep.subr.bf16.mxu0 %v370_v33 }
  0xfc   :  { %246 = vmatpush3.bf16.xpose.msra.mxu0 %v165_v47 }
  0xfd   :  { %247 = vmatprep.subr.bf16.mxu0 %v370_v33 }
 0x104   :  { %248 = vmatpush3.bf16.xpose.msra.mxu0 %v166_v51 }
 0x10b   :  { %250 = vmatmul.mubr.bf16.vlgmr.msra.gmra.mrb[0].mxu0 %v158_v25 }
 0x1de   :  { %v201_v24 = vpop.f32.mrb[0].mxu0 }
 0x1df   :  { %207 = vst [vmem:[#allocation7] sm:$0xff] %v201_v24  ;;  %v251_v53 = vpop.f32.mrb[1].mxu0 }
 0x1e0   :  { %v204_v54 = vpop.f32.mrb[2].mxu0 }
 0x1e1   :  { %349 = shalt.err (!%p346_p6)
}
 0x1e2   :  { %s350_s10 = scalar_lea.hbm %s527_s2, 128 }
 0x1e3   :  { %p351_p7 = scmp.ne.s32.totalorder %s527_s2, %s350_s10  ;;  %p354_p8 = scmp.lt.u32.totalorder %s350_s10, %s527_s2 }
 0x1e5   :  { %p356_p9 = pnand %p354_p8, %p351_p7 }
 0x1e7   :  { %359 = shalt.err (!%p356_p9)
}
 0x1e8   :  { %217 = dma.vmem_to_hbm [thread:$0]  %s215_s6, 128, %s527_s2, [#allocation4]   ;;  %v252_v28 = vpop.f32.mrb[3].mxu0 }
 0x1e9   :  { %364 = dma.done.wait [#allocation4], 128  }
 0x1ea   :  { %365 = vsyncadd [#allocation4], 4294967168 }
 0x1eb   :  { %221 = vsyncpa [#allocation3], 1 }
 0x1ec   :  { %222 = vsyncpa [#allocation6], 1 }
 0x1ed   :  { %223 = vsyncpa [#allocation4], 1 }

</bundles_post_ra>
